<compile_context>
chip_gen: v7x
topology: tpu7x:2x2x1
jax: 0.10.0
libtpu: 0.0.40
codegen_flags: <defaults>
</compile_context>

<pallas_src>
import functools

import jax
import jax.numpy as jnp
from jax.experimental import pallas as pl
from jax.experimental.pallas import tpu as pltpu

GAMMA = 1.5
ALPHA = 0.25
LANES = 128
SUBLANES = 8
# Large finite positive logit for lane padding: with true=1.0 the focal loss of
# a pad element underflows to ~0.  NOT +inf (inf - inf*t would give NaN in BCE).
_PAD_LOGIT = 30.0


def _round_up(x, m):
    return (x + m - 1) // m * m


def _default_num_strips():
    """Use 2 parallel strips only on multi-TensorCore chips (v7x); else 1."""
    try:
        kind = jax.devices()[0].device_kind.lower()
    except Exception:
        return 1
    return 2 if "v7" in kind else 1


def _focal_loss_kernel(pred_ref, true_ref, out_ref, acc_ref, *, gamma, alpha,
                       row_tile, total_rows):
    i_id = pl.program_id(1)
    inner_steps = pl.num_programs(1)

    @pl.when(i_id == 0)
    def _():
        acc_ref[...] = jnp.zeros_like(acc_ref)

    x = pred_ref[...].astype(jnp.float32)
    t = true_ref[...].astype(jnp.float32)

    # exp(-|x|) is shared by the stable-BCE log term and the sigmoid.
    e = jnp.exp(-jnp.abs(x))
    # BCEWithLogitsLoss(reduction='none'): max(x,0) - x*t + log(1 + exp(-|x|)).
    # e in (0,1] so 1+e in (1,2]: plain log is as accurate as log1p here.
    bce = jnp.maximum(x, 0.0) - x * t + jnp.log(1.0 + e)

    # sigmoid(x) from the shared e; approx reciprocal runs in the EUP slot and
    # skips the VALU Newton refinement of a full-precision divide.
    r = pl.reciprocal(1.0 + e, approx=True)
    p = jnp.where(x >= 0.0, r, e * r)

    # Affine forms (fewer VALU ops):
    #   p_t          = t*p + (1-t)*(1-p) = (1-p) + t*(2p-1)
    #   alpha_factor = t*a + (1-t)*(1-a) = (1-a) + t*(2a-1)
    p_t = (1.0 - p) + t * (2.0 * p - 1.0)
    alpha_factor = (1.0 - alpha) + t * (2.0 * alpha - 1.0)

    # Clamp at 0: the approx reciprocal may overshoot 1 slightly; sqrt of a tiny
    # negative would otherwise poison the whole sum with NaN.
    m = jnp.maximum(1.0 - p_t, 0.0)
    # Specialize common gammas; generic fractional pow is exp(gamma*log(m)).
    if gamma == 1.5:
        mod = m * jnp.sqrt(m)
    elif gamma == 2.0:
        mod = m * m
    elif gamma == 1.0:
        mod = m
    elif gamma == 0.0:
        mod = jnp.ones_like(m)
    else:
        mod = m ** gamma

    loss = bce * alpha_factor * mod

    def _accumulate(vals):
        # vreg-shaped partial sums: pure VPU adds every step; the single
        # cross-lane reduce happens once in the wrapper.
        acc_ref[...] += vals.reshape(row_tile // SUBLANES, SUBLANES, LANES).sum(0)

    if total_rows % row_tile != 0:
        # Only the globally last block is ragged; mask there and nowhere else.
        # Row indices fit int32 for any input below ~2^31 * 128 elements.
        p_id = pl.program_id(0)
        is_last_block = jnp.logical_and(p_id == pl.num_programs(0) - 1,
                                        i_id == inner_steps - 1)

        @pl.when(is_last_block)
        def _():
            block_row0 = (p_id * inner_steps + i_id) * row_tile
            row_iota = jax.lax.broadcasted_iota(jnp.int32, (row_tile, LANES), 0)
            _accumulate(jnp.where(block_row0 + row_iota < total_rows, loss, 0.0))

        @pl.when(jnp.logical_not(is_last_block))
        def _():
            _accumulate(loss)
    else:
        _accumulate(loss)

    @pl.when(i_id == inner_steps - 1)
    def _():
        out_ref[...] = acc_ref[...][None]


def focal_loss(pred, true, *, gamma=GAMMA, alpha=ALPHA, row_tile_cap=4096,
               num_strips=None):
    """Focal loss with mean reduction (loss_fcn = BCEWithLogitsLoss('mean'))."""
    assert pred.shape == true.shape
    total = pred.size

    # Feed the caller's native dtype (bf16 etc. stays bf16 over HBM); the
    # kernel upcasts to f32 internally.
    flat_pred = pred.reshape(-1)
    flat_true = true.reshape(-1)

    rem = total % LANES
    if rem:
        # Rare unaligned path: padding materializes a copy of both inputs (one
        # extra HBM read+write each).  Pad values are chosen so pad elements
        # contribute ~0 loss and need no in-kernel masking.
        pad = LANES - rem
        flat_pred = jnp.pad(flat_pred, (0, pad), constant_values=_PAD_LOGIT)
        flat_true = jnp.pad(flat_true, (0, pad), constant_values=1)
    rows = flat_pred.size // LANES

    pred2d = flat_pred.reshape(rows, LANES)
    true2d = flat_true.reshape(rows, LANES)

    # Largest row tile <= cap, multiple of 8 sublanes.  4096 rows = 2 MiB f32
    # per input block; 2 inputs x 2 pipeline buffers = 8 MiB working set.
    row_tile = min(_round_up(row_tile_cap, SUBLANES), _round_up(rows, SUBLANES))
    nblocks = pl.cdiv(rows, row_tile)

    if num_strips is None:
        num_strips = _default_num_strips()
    if nblocks < num_strips or nblocks % num_strips != 0:
        num_strips = 1  # keep the grid covering exactly `nblocks` row blocks
    inner_steps = nblocks // num_strips

    kernel = functools.partial(_focal_loss_kernel, gamma=gamma, alpha=alpha,
                               row_tile=row_tile, total_rows=rows)

    in_map = lambda s, i: (s * inner_steps + i, 0)

    partials = pl.pallas_call(
        kernel,
        out_shape=jax.ShapeDtypeStruct((num_strips, SUBLANES, LANES),
                                       jnp.float32),
        grid_spec=pltpu.PrefetchScalarGridSpec(
            num_scalar_prefetch=0,
            grid=(num_strips, inner_steps),
            in_specs=[
                pl.BlockSpec((row_tile, LANES), in_map),
                pl.BlockSpec((row_tile, LANES), in_map),
            ],
            out_specs=pl.BlockSpec((1, SUBLANES, LANES),
                                   lambda s, i: (s, 0, 0)),
            scratch_shapes=[pltpu.VMEM((SUBLANES, LANES), jnp.float32)],
        ),
        compiler_params=pltpu.CompilerParams(
            dimension_semantics=("parallel", "arbitrary")),
    )(pred2d, true2d)

    # Single cross-lane reduce of the per-strip vreg partials, then the mean.
    return jnp.sum(partials) / jnp.float32(total)


def focal_loss_ref(pred, true, gamma=GAMMA, alpha=ALPHA):
    """Pure-JAX reference matching the PyTorch module (mean reduction)."""
    x = pred.astype(jnp.float32)
    t = true.astype(jnp.float32)
    bce = jnp.maximum(x, 0.0) - x * t + jnp.log1p(jnp.exp(-jnp.abs(x)))
    p = jax.nn.sigmoid(x)
    p_t = t * p + (1.0 - t) * (1.0 - p)
    alpha_factor = t * alpha + (1.0 - t) * (1.0 - alpha)
    modulating_factor = (1.0 - p_t) ** gamma
    return jnp.mean(bce * alpha_factor * modulating_factor)


if __name__ == "__main__":
    key = jax.random.PRNGKey(0)
    k_pred, k_true = jax.random.split(key)

    # NCHW, consistent with typical detection-head logits.
    N, C, H, W = 2, 4, 16, 16
    pred = jax.random.normal(k_pred, (N, C, H, W), dtype=jnp.float32) * 2.0
    true = jax.random.bernoulli(k_true, p=0.3, shape=(N, C, H, W)).astype(
        jnp.float32)

    out = jax.block_until_ready(focal_loss(pred, true))
    ref = focal_loss_ref(pred, true)

    # The kernel uses the EUP approximate reciprocal for the sigmoid (per perf
    # review); allow a small relative slack vs. the exact-divide reference.
    assert jnp.allclose(out, ref, rtol=1e-2, atol=1e-4), (out, ref)

    print("KERNEL_OK")
</pallas_src>

<mosaic_0001>
module attributes {stable_mosaic.version = 11 : i64} {
  func.func @_focal_loss_kernel(%arg0: i32, %arg1: i32, %arg2: memref<16x128xf32, #tpu.memory_space<vmem>>, %arg3: memref<16x128xf32, #tpu.memory_space<vmem>>, %arg4: memref<1x8x128xf32, #tpu.memory_space<vmem>>, %arg5: memref<8x128xf32, #tpu.memory_space<vmem>>) attributes {dimension_semantics = [#tpu.dimension_semantics<parallel>, #tpu.dimension_semantics<arbitrary>], iteration_bounds = array<i64: 1, 1>, scalar_prefetch = 0 : i64, scratch_operands = 1 : i64, tpu.core_type = #tpu.core_type<tc>, window_params = [{transform_indices = @transform_0, window_bounds = array<i64: 16, 128>}, {transform_indices = @transform_1, window_bounds = array<i64: 16, 128>}, {transform_indices = @transform_2, window_bounds = array<i64: 1, 8, 128>}]} {
    %c0_i32 = arith.constant 0 : i32
    %0 = arith.cmpi eq, %arg1, %c0_i32 : i32
    %1 = arith.extui %0 : i1 to i32
    %c0_i32_0 = arith.constant 0 : i32
    %2 = arith.cmpi ne, %1, %c0_i32_0 : i32
    scf.if %2 {
      %cst_22 = arith.constant 0.000000e+00 : f32
      %52 = vector.broadcast %cst_22 : f32 to vector<8x128xf32>
      %c0_23 = arith.constant 0 : index
      %c0_24 = arith.constant 0 : index
      %53 = vector.load %arg5[%c0_23, %c0_24] : memref<8x128xf32, #tpu.memory_space<vmem>>, vector<8x128xf32>
      tpu.vector_store %arg5[%c0_23, %c0_24], %52 {strides = array<i32>} : memref<8x128xf32, #tpu.memory_space<vmem>>, vector<8x128xf32>,
    } else {
    }
    %c0 = arith.constant 0 : index
    %c0_1 = arith.constant 0 : index
    %3 = vector.load %arg2[%c0, %c0_1] : memref<16x128xf32, #tpu.memory_space<vmem>>, vector<16x128xf32>
    %c0_2 = arith.constant 0 : index
    %c0_3 = arith.constant 0 : index
    %4 = vector.load %arg3[%c0_2, %c0_3] : memref<16x128xf32, #tpu.memory_space<vmem>>, vector<16x128xf32>
    %5 = math.absf %3 : vector<16x128xf32>
    %cst = arith.constant 0.000000e+00 : f32
    %6 = vector.broadcast %cst : f32 to vector<16x128xf32>
    %7 = arith.subf %6, %5 : vector<16x128xf32>
    %8 = math.exp %7 : vector<16x128xf32>
    %cst_4 = arith.constant 0.000000e+00 : f32
    %9 = vector.broadcast %cst_4 : f32 to vector<16x128xf32>
    %10 = arith.maximumf %3, %9 : vector<16x128xf32>
    %11 = arith.mulf %3, %4 : vector<16x128xf32>
    %12 = arith.subf %10, %11 : vector<16x128xf32>
    %cst_5 = arith.constant 1.000000e+00 : f32
    %13 = vector.broadcast %cst_5 : f32 to vector<16x128xf32>
    %14 = arith.addf %13, %8 : vector<16x128xf32>
    %15 = math.log %14 : vector<16x128xf32>
    %16 = arith.addf %12, %15 : vector<16x128xf32>
    %cst_6 = arith.constant 1.000000e+00 : f32
    %17 = vector.broadcast %cst_6 : f32 to vector<16x128xf32>
    %18 = arith.addf %17, %8 : vector<16x128xf32>
    %19 = tpu.reciprocal %18 {approx = true} : vector<16x128xf32> -> vector<16x128xf32>
    %cst_7 = arith.constant 0.000000e+00 : f32
    %20 = vector.broadcast %cst_7 : f32 to vector<16x128xf32>
    %21 = arith.cmpf oge, %3, %20 : vector<16x128xf32>
    %22 = arith.mulf %8, %19 : vector<16x128xf32>
    %23 = arith.select %21, %19, %22 : vector<16x128xi1>, vector<16x128xf32>
    %cst_8 = arith.constant 1.000000e+00 : f32
    %24 = vector.broadcast %cst_8 : f32 to vector<16x128xf32>
    %25 = arith.subf %24, %23 : vector<16x128xf32>
    %cst_9 = arith.constant 2.000000e+00 : f32
    %26 = vector.broadcast %cst_9 : f32 to vector<16x128xf32>
    %27 = arith.mulf %26, %23 : vector<16x128xf32>
    %cst_10 = arith.constant 1.000000e+00 : f32
    %28 = vector.broadcast %cst_10 : f32 to vector<16x128xf32>
    %29 = arith.subf %27, %28 : vector<16x128xf32>
    %30 = arith.mulf %4, %29 : vector<16x128xf32>
    %31 = arith.addf %25, %30 : vector<16x128xf32>
    %cst_11 = arith.constant -5.000000e-01 : f32
    %32 = vector.broadcast %cst_11 : f32 to vector<16x128xf32>
    %33 = arith.mulf %4, %32 : vector<16x128xf32>
    %cst_12 = arith.constant 7.500000e-01 : f32
    %34 = vector.broadcast %cst_12 : f32 to vector<16x128xf32>
    %35 = arith.addf %34, %33 : vector<16x128xf32>
    %cst_13 = arith.constant 1.000000e+00 : f32
    %36 = vector.broadcast %cst_13 : f32 to vector<16x128xf32>
    %37 = arith.subf %36, %31 : vector<16x128xf32>
    %cst_14 = arith.constant 0.000000e+00 : f32
    %38 = vector.broadcast %cst_14 : f32 to vector<16x128xf32>
    %39 = arith.maximumf %37, %38 : vector<16x128xf32>
    %40 = math.sqrt %39 : vector<16x128xf32>
    %41 = arith.mulf %39, %40 : vector<16x128xf32>
    %42 = arith.mulf %16, %35 : vector<16x128xf32>
    %43 = arith.mulf %42, %41 : vector<16x128xf32>
    %c0_15 = arith.constant 0 : index
    %c0_16 = arith.constant 0 : index
    %44 = vector.load %arg5[%c0_15, %c0_16] : memref<8x128xf32, #tpu.memory_space<vmem>>, vector<8x128xf32>
    %45 = vector.shape_cast %43 : vector<16x128xf32> to vector<2x8x128xf32>
    %cst_17 = arith.constant dense<0.000000e+00> : vector<8x128xf32>
    %46 = vector.multi_reduction <add>, %45, %cst_17 [0] : vector<2x8x128xf32> to vector<8x128xf32>
    %47 = arith.addf %44, %46 : vector<8x128xf32>
    %c0_18 = arith.constant 0 : index
    %c0_19 = arith.constant 0 : index
    %48 = vector.load %arg5[%c0_18, %c0_19] : memref<8x128xf32, #tpu.memory_space<vmem>>, vector<8x128xf32>
    tpu.vector_store %arg5[%c0_18, %c0_19], %47 {strides = array<i32>} : memref<8x128xf32, #tpu.memory_space<vmem>>, vector<8x128xf32>,
    %c0_i32_20 = arith.constant 0 : i32
    %49 = arith.cmpi eq, %arg1, %c0_i32_20 : i32
    %50 = arith.extui %49 : i1 to i32
    %c0_i32_21 = arith.constant 0 : i32
    %51 = arith.cmpi ne, %50, %c0_i32_21 : i32
    scf.if %51 {
      %c0_22 = arith.constant 0 : index
      %c0_23 = arith.constant 0 : index
      %52 = vector.load %arg5[%c0_22, %c0_23] : memref<8x128xf32, #tpu.memory_space<vmem>>, vector<8x128xf32>
      %53 = vector.shape_cast %52 : vector<8x128xf32> to vector<1x8x128xf32>
      %c0_24 = arith.constant 0 : index
      %c0_25 = arith.constant 0 : index
      %c0_26 = arith.constant 0 : index
      %54 = vector.load %arg4[%c0_24, %c0_25, %c0_26] : memref<1x8x128xf32, #tpu.memory_space<vmem>>, vector<1x8x128xf32>
      tpu.vector_store %arg4[%c0_24, %c0_25, %c0_26], %53 {strides = array<i32>} : memref<1x8x128xf32, #tpu.memory_space<vmem>>, vector<1x8x128xf32>,
    } else {
    }
    return
  }
  func.func @transform_0(%arg0: i32, %arg1: i32) -> (i32, i32) {
    %c1_i32 = arith.constant 1 : i32
    %0 = arith.muli %arg0, %c1_i32 : i32
    %1 = arith.addi %0, %arg1 : i32
    %c0_i32 = arith.constant 0 : i32
    %c0_i32_0 = arith.constant 0 : i32
    return %1, %c0_i32 : i32, i32
  }
  func.func @transform_1(%arg0: i32, %arg1: i32) -> (i32, i32) {
    %c1_i32 = arith.constant 1 : i32
    %0 = arith.muli %arg0, %c1_i32 : i32
    %1 = arith.addi %0, %arg1 : i32
    %c0_i32 = arith.constant 0 : i32
    %c0_i32_0 = arith.constant 0 : i32
    return %1, %c0_i32 : i32, i32
  }
  func.func @transform_2(%arg0: i32, %arg1: i32) -> (i32, i32, i32) {
    %c0_i32 = arith.constant 0 : i32
    %c0_i32_0 = arith.constant 0 : i32
    %c0_i32_1 = arith.constant 0 : i32
    return %arg0, %c0_i32, %c0_i32_0 : i32, i32, i32
  }
}

</mosaic_0001>

<bundles_post_ra>
// kernel: tpu_custom_call.1
= control target key start
LH: loop header
LB: loop body
LE: loop exit
PB: predicated region body
PF: predicated region fallthrough
CT: control target
= control target key end

     0   :  { %7 = vsyncpa [#allocation4], 0  ;;  %s305_s0 = inlined_call_operand.hbm [shape: f32[16,128], index: 0, kind: input, shape index: {}]   ;;  %s306_s1 = inlined_call_operand.hbm [shape: f32[16,128], index: 1, kind: input, shape index: {}]   ;;  %s307_s2 = inlined_call_operand.hbm [shape: f32[1,8,128], index: 2, kind: output, shape index: {}]  }
   0x1   :  { %8 = vsyncpa [#allocation7], 0 }
   0x2   :  { %9 = vsyncpa [#allocation5], 0  ;;  %s249_s9 = smov [#allocation3]   ;;  %s177_s13 = scalar_lea.hbm %s305_s0, 256 }
   0x3   :  { %s19_s10 = sshll.u32 %s249_s9, 4  ;;  %p178_p0 = scmp.ne.s32.totalorder %s305_s0, %s177_s13  ;;  %s20_s10 = int_to_ptr.vmem [resolvable:$true] %s19_s10 }
   0x4   :  { %p181_p1 = scmp.lt.u32.totalorder %s177_s13, %s305_s0 }
   0x6   :  { %p183_p2 = pnand %p181_p1, %p178_p0 }
   0x8   :  { %186 = shalt.err (!%p183_p2)
}
   0x9   :  { %s187_s18 = scalar_lea.vmem %s20_s10, 256  ;;  %p192_p4 = scmp.lt.s32.totalorder %s20_s10, %s20_s10 }
   0xa   :  { %p188_p3 = scmp.ne.s32.totalorder %s20_s10, %s187_s18  ;;  %p193_p5 = scmp.lt.s32.totalorder %s187_s18, %s187_s18 }
   0xc   :  { %p194_p6 = por %p193_p5, %p192_p4 }
   0xe   :  { %p195_p7 = pnand %p194_p6, %p188_p3 }
  0x10   :  { %198 = shalt.err (!%p195_p7)
}
  0x11   :  { %s250_s19 = smov 128   ;;  %s251_s20 = smov 8  }
  0x12   :  { %25 = dma.hbm_to_vmem [thread:$0]  %s305_s0, 256, %s20_s10, [#allocation4], %s250_s19, %s250_s19, %s251_s20  }
  0x13   :  { %s252_s23 = smov [#allocation6]   ;;  %s199_s27 = scalar_lea.hbm %s306_s1, 256 }
  0x14   :  { %s35_s24 = sshll.u32 %s252_s23, 4  ;;  %p200_p8 = scmp.ne.s32.totalorder %s306_s1, %s199_s27  ;;  %s36_s24 = int_to_ptr.vmem [resolvable:$true] %s35_s24 }
  0x15   :  { %p203_p9 = scmp.lt.u32.totalorder %s199_s27, %s306_s1 }
  0x17   :  { %p205_p10 = pnand %p203_p9, %p200_p8 }
  0x19   :  { %208 = shalt.err (!%p205_p10)
}
  0x1a   :  { %s209_s4 = scalar_lea.vmem %s36_s24, 256  ;;  %p214_p12 = scmp.lt.s32.totalorder %s36_s24, %s36_s24 }
  0x1b   :  { %p210_p11 = scmp.ne.s32.totalorder %s36_s24, %s209_s4  ;;  %p215_p13 = scmp.lt.s32.totalorder %s209_s4, %s209_s4 }
  0x1d   :  { %p216_p0 = por %p215_p13, %p214_p12 }
  0x1f   :  { %p217_p1 = pnand %p216_p0, %p210_p11 }
  0x21   :  { %220 = shalt.err (!%p217_p1)
}
  0x22   :  { %41 = dma.hbm_to_vmem [thread:$0]  %s306_s1, 256, %s36_s24, [#allocation7], %s250_s19, %s250_s19, %s251_s20  }
  0x23   :  { %243 = dma.done.wait [#allocation4], 256  }
  0x24   :  { %244 = vsyncadd [#allocation4], 4294967040 }
  0x25   :  { %245 = dma.done.wait [#allocation7], 256  }
  0x26   :  { %246 = vsyncadd [#allocation7], 4294967040  ;;  %v57_v0 = vld [vmem:[#allocation3] sm:$0xff]  ;;  %v58_v1 = vld [vmem:[#allocation3 + $0x8] sm:$0xff]  ;;  %s253_s1 = smov [#allocation8]  }
  0x27   :  { %v61_v2 = vand.u32 2147483647, %v57_v0  ;;  %v62_v3 = vand.u32 2147483647, %v58_v1  ;;  %vm85_vm0 = vcmp.ge.f32.partialorder %v57_v0, 0.0  ;;  %vm86_vm1 = vcmp.ge.f32.partialorder %v58_v1, 0.0 }
  0x28   :  { %v59_v19 = vld [vmem:[#allocation6] sm:$0xff]  ;;  %v60_v21 = vld [vmem:[#allocation6 + $0x8] sm:$0xff]  ;;  %v69_v34 = vmax.f32 %v57_v0, 0.0  ;;  %v70_v37 = vmax.f32 %v58_v1, 0.0  ;;  %s144_s6 = sshll.u32 %s253_s1, 4  ;;  %s145_s6 = int_to_ptr.vmem [resolvable:$true] %s144_s6 }
  0x29   :  { %v63_v4 = vsub.f32 0.0, %v61_v2  ;;  %v64_v5 = vsub.f32 0.0, %v62_v3  ;;  %v71_v35 = vmul.f32 %v59_v19, %v57_v0  ;;  %v72_v38 = vmul.f32 %v60_v21, %v58_v1  ;;  %s221_s7 = scalar_lea.vmem %s145_s6, 128  ;;  %p226_p3 = scmp.lt.s32.totalorder %s145_s6, %s145_s6 }
  0x2a   :  { %v101_v42 = vmul.f32 -0.5, %v59_v19  ;;  %v102_v45 = vmul.f32 -0.5, %v60_v21  ;;  %p222_p2 = scmp.ne.s32.totalorder %s145_s6, %s221_s7  ;;  %p227_p4 = scmp.lt.s32.totalorder %s221_s7, %s221_s7 }
  0x2b   :  { %v65_v6 = vmul.f32 1.442695, %v63_v4  ;;  %v67_v7 = vmul.f32 1.442695, %v64_v5  ;;  %v73_v40 = vsub.f32 %v69_v34, %v71_v35  ;;  %v74_v43 = vsub.f32 %v70_v37, %v72_v38 }
  0x2c   :  { %v103_v47 = vadd.f32 0.75, %v101_v42  ;;  %v104_v50 = vadd.f32 0.75, %v102_v45  ;;  %p228_p5 = por %p227_p4, %p226_p3 }
  0x2d   :  { %161 = vpow2.f32 %v65_v6 }
  0x2e   :  { %163 = vpow2.f32 %v67_v7  ;;  %p229_p6 = pnand %p228_p5, %p222_p2 }
  0x37   :  { %v162_v8 = vpop.eup %161 }
  0x38   :  { %v164_v9 = vpop.eup %163  ;;  %v75_v10 = vadd.f32 1.0, %v162_v8 }
  0x39   :  { %v76_v11 = vadd.f32 1.0, %v164_v9 }
  0x3a   :  { %165 = vrcp.f32 %v75_v10 }
  0x3b   :  { %167 = vrcp.f32 %v76_v11 }
  0x3c   :  { %169 = vlog2.f32 %v75_v10 }
  0x3d   :  { %171 = vlog2.f32 %v76_v11 }
  0x44   :  { %v166_v12 = vpop.eup %165 }
  0x45   :  { %v168_v13 = vpop.eup %167  ;;  %v87_v14 = vmul.f32 %v166_v12, %v162_v8 }
  0x46   :  { %v88_v15 = vmul.f32 %v168_v13, %v164_v9  ;;  %v170_v36 = vpop.eup %169 }
  0x47   :  { %v89_v16 = vsel %vm85_vm0, %v166_v12, %v87_v14  ;;  %v172_v39 = vpop.eup %171  ;;  %v78_v41 = vmul.f32 0.6931472, %v170_v36 }
  0x48   :  { %v90_v17 = vsel %vm86_vm1, %v168_v13, %v88_v15  ;;  %v93_v18 = vmul.f32 2.0, %v89_v16  ;;  %v91_v22 = vsub.f32 1.0, %v89_v16  ;;  %v80_v44 = vmul.f32 0.6931472, %v172_v39 }
  0x49   :  { %v94_v20 = vmul.f32 2.0, %v90_v17  ;;  %v92_v24 = vsub.f32 1.0, %v90_v17  ;;  %v81_v46 = vadd.f32 %v78_v41, %v73_v40 }
  0x4a   :  { %v154_v23 = vadd.f32 -1.0, %v93_v18  ;;  %v82_v49 = vadd.f32 %v80_v44, %v74_v43 }
  0x4b   :  { %v155_v25 = vadd.f32 -1.0, %v94_v20  ;;  %v125_v57 = vmul.f32 %v103_v47, %v81_v46 }
  0x4c   :  { %v97_v26 = vmul.f32 %v154_v23, %v59_v19  ;;  %v126_v60 = vmul.f32 %v104_v50, %v82_v49 }
  0x4d   :  { %v98_v27 = vmul.f32 %v155_v25, %v60_v21 }
  0x4e   :  { %v99_v28 = vadd.f32 %v97_v26, %v91_v22 }
  0x4f   :  { %v100_v29 = vadd.f32 %v98_v27, %v92_v24 }
  0x50   :  { %v105_v30 = vsub.f32 1.0, %v99_v28 }
  0x51   :  { %v106_v31 = vsub.f32 1.0, %v100_v29 }
  0x52   :  { %v107_v32 = vmax.f32 %v105_v30, 0.0 }
  0x53   :  { %v108_v33 = vmax.f32 %v106_v31, 0.0 }
  0x54   :  { %173 = vrsqrt.f32 %v107_v32  ;;  %vm111_vm2 = vcmp.eq.f32.partialorder %v107_v32, inf  ;;  %v114_v51 = vand.u32 2147483648, %v107_v32  ;;  %vm113_vm3 = vcmp.eq.f32.partialorder %v107_v32, 0.0 }
  0x55   :  { %175 = vrsqrt.f32 %v108_v33  ;;  %vm118_vm4 = vcmp.eq.f32.partialorder %v108_v33, inf  ;;  %v121_v54 = vand.u32 2147483648, %v108_v33  ;;  %vm120_vm5 = vcmp.eq.f32.partialorder %v108_v33, 0.0 }
  0x5e   :  { %v174_v48 = vpop.eup %173 }
  0x5f   :  { %v176_v52 = vpop.eup %175  ;;  %v110_v53 = vmul.f32 %v174_v48, %v107_v32 }
  0x60   :  { %v117_v55 = vmul.f32 %v176_v52, %v108_v33 }
  0x61   :  { %v112_v56 = vsel %vm111_vm2, %v107_v32, %v110_v53 }
  0x62   :  { %v115_v58 = vsel %vm113_vm3, %v114_v51, %v112_v56  ;;  %v119_v59 = vsel %vm118_vm4, %v108_v33, %v117_v55 }
  0x63   :  { %v122_v61 = vsel %vm120_vm5, %v121_v54, %v119_v59  ;;  %v123_v62 = vmul.f32 %v115_v58, %v107_v32 }
  0x64   :  { %v124_v63 = vmul.f32 %v122_v61, %v108_v33 }
  0x65   :  { %v127_v0 = vmul.f32 %v125_v57, %v123_v62 }
  0x66   :  { %v128_v1 = vmul.f32 %v126_v60, %v124_v63 }
  0x68   :  { %v130_v2 = vadd.f32 %v128_v1, %v127_v0 }
  0x6a   :  { %137 = vst [vmem:[#allocation8] sm:$0xff] %v130_v2 }
  0x6b   :  { %232 = shalt.err (!%p229_p6)
}
  0x6c   :  { %s233_s10 = scalar_lea.hbm %s307_s2, 128 }
  0x6d   :  { %p234_p7 = scmp.ne.s32.totalorder %s307_s2, %s233_s10  ;;  %p237_p8 = scmp.lt.u32.totalorder %s233_s10, %s307_s2 }
  0x6f   :  { %p239_p9 = pnand %p237_p8, %p234_p7 }
  0x71   :  { %242 = shalt.err (!%p239_p9)
}
  0x72   :  { %147 = dma.vmem_to_hbm [thread:$0]  %s145_s6, 128, %s307_s2, [#allocation5]  }
  0x73   :  { %247 = dma.done.wait [#allocation5], 128  }
  0x74   :  { %248 = vsyncadd [#allocation5], 4294967168 }
  0x75   :  { %151 = vsyncpa [#allocation4], 1 }
  0x76   :  { %152 = vsyncpa [#allocation7], 1 }
  0x77   :  { %153 = vsyncpa [#allocation5], 1 }

</bundles_post_ra>
